<compile_context>
chip_gen: v7x
topology: tpu7x:2x2x1
jax: 0.10.0
libtpu: 0.0.40
codegen_flags: <defaults>
</compile_context>

<pallas_src>
import math

import jax
import jax.numpy as jnp
from jax.experimental import pallas as pl
from jax.experimental.pallas import tpu as pltpu


# --------------------------------- helpers ---------------------------------- #
def _round_up(n, m):
    return ((n + m - 1) // m) * m


def _mxu_lane_target():
    """Packing target for the lane axis: 256 on v6e/v7x (2x256 MXU), 128 on v5e
    and unknown parts (4x128 MXU; wider tiles only add DMA bytes there)."""
    try:
        kind = jax.devices()[0].device_kind.lower()
    except Exception:
        return 128
    if "v6" in kind or "v7" in kind:
        return 256
    return 128


def _pick_tile(dim, candidates=(512, 256, 128)):
    for c in candidates:
        if dim % c == 0:
            return c
    return dim  # fall back to the full (untiled) dimension


# ---------------------- Path A: grouped block-diagonal ---------------------- #
def _make_group_kernel(G, In, Out):
    def kernel(x_ref, w_ref, b_ref, out_ref, wbd_ref):
        # x_ref: (G, Bp, In)  w_ref: (G, In, Out)  b_ref: (G, 1, Out)
        # out_ref: (G, Bp, Out)  wbd_ref: VMEM scratch (G*In, G*Out)
        #
        # Build the block-diagonal weight in VMEM: zero + G diagonal writes.
        # Zeroing every step is cheap (a few vregs) and stays correct when the
        # "parallel" group axis is sharded across TensorCores.
        wbd_ref[...] = jnp.zeros_like(wbd_ref)
        for g in range(G):
            wbd_ref[g * In:(g + 1) * In, g * Out:(g + 1) * Out] = w_ref[g]

        # Pack the G members along the lane axis: (Bp, G*In).  This replaces
        # the XLA-side transpose+reshape of the previous version.
        x_packed = jnp.concatenate([x_ref[g] for g in range(G)], axis=-1)

        # One full-width MXU matmul per group, f32 accumulation.
        acc = jnp.dot(x_packed, wbd_ref[...], preferred_element_type=jnp.float32)

        # Unpack lanes back to the required (G, Bp, Out) layout and add bias.
        # (The narrow last dim here is inherent to the module's (E, B, Out)
        # output layout; keeping the packed (Bp, G*Out) layout end-to-end in a
        # surrounding model would avoid it entirely.)
        for g in range(G):
            out_ref[g] = (acc[:, g * Out:(g + 1) * Out] + b_ref[g]).astype(out_ref.dtype)

    return kernel


def _forward_grouped(x, weight, bias, G, out_dtype):
    E, B, In = x.shape
    Out = weight.shape[-1]
    Gn = pl.cdiv(E, G)
    E_pad = Gn * G
    Bp = _round_up(B, 8)  # sublane alignment for f32

    if E_pad != E or Bp != B:
        x = jnp.pad(x, ((0, E_pad - E), (0, Bp - B), (0, 0)))
    if E_pad != E:
        weight = jnp.pad(weight, ((0, E_pad - E), (0, 0), (0, 0)))
        bias = jnp.pad(bias, ((0, E_pad - E), (0, 0), (0, 0)))

    # TODO(synk): pad G*In / G*Out up to a multiple of 128 lanes for odd shapes
    # (perf-only; correctness does not require it).
    out = pl.pallas_call(
        _make_group_kernel(G, In, Out),
        out_shape=jax.ShapeDtypeStruct((E_pad, Bp, Out), out_dtype),
        grid=(Gn,),
        in_specs=[
            pl.BlockSpec((G, Bp, In), lambda i: (i, 0, 0)),
            pl.BlockSpec((G, In, Out), lambda i: (i, 0, 0)),
            pl.BlockSpec((G, 1, Out), lambda i: (i, 0, 0)),
        ],
        out_specs=pl.BlockSpec((G, Bp, Out), lambda i: (i, 0, 0)),
        scratch_shapes=[pltpu.VMEM((G * In, G * Out), weight.dtype)],
        compiler_params=pltpu.CompilerParams(dimension_semantics=("parallel",)),
    )(x, weight, bias)

    if E_pad != E or Bp != B:
        out = out[:E, :B, :]
    return out


# --------------------- Path B: wide layers (K/N tiling) --------------------- #
def _vlinear_tiled_kernel(x_ref, w_ref, b_ref, out_ref, acc_ref):
    # x_ref: (1, Bp, bk)  w_ref: (1, bk, bn)  b_ref: (1, 1, bn)
    # out_ref: (1, Bp, bn)  acc_ref: VMEM (Bp, bn) f32
    @pl.when(pl.program_id(2) == 0)
    def _():
        acc_ref[...] = jnp.zeros_like(acc_ref)

    acc_ref[...] += jnp.dot(x_ref[0], w_ref[0], preferred_element_type=jnp.float32)

    @pl.when(pl.program_id(2) == pl.num_programs(2) - 1)
    def _():
        out_ref[0] = (acc_ref[...] + b_ref[0]).astype(out_ref.dtype)


def _forward_tiled(x, weight, bias, out_dtype):
    E, B, In = x.shape
    Out = weight.shape[-1]
    Bp = _round_up(B, 8)
    if Bp != B:
        x = jnp.pad(x, ((0, 0), (0, Bp - B), (0, 0)))

    bk = _pick_tile(In)
    bn = _pick_tile(Out)
    grid = (E, Out // bn, In // bk)

    out = pl.pallas_call(
        _vlinear_tiled_kernel,
        out_shape=jax.ShapeDtypeStruct((E, Bp, Out), out_dtype),
        grid=grid,
        in_specs=[
            pl.BlockSpec((1, Bp, bk), lambda e, n, k: (e, 0, k)),
            pl.BlockSpec((1, bk, bn), lambda e, n, k: (e, k, n)),
            pl.BlockSpec((1, 1, bn), lambda e, n, k: (e, 0, n)),
        ],
        out_specs=pl.BlockSpec((1, Bp, bn), lambda e, n, k: (e, 0, n)),
        scratch_shapes=[pltpu.VMEM((Bp, bn), jnp.float32)],
        compiler_params=pltpu.CompilerParams(
            dimension_semantics=("parallel", "parallel", "arbitrary"),
            vmem_limit_bytes=32 * 1024 * 1024),
    )(x, weight, bias)

    if Bp != B:
        out = out[:, :B, :]
    return out


# --------------------------------- wrapper ----------------------------------- #
def vectorized_linear_forward(x, weight, bias, *, lane_target=None, wide_path_bf16=True):
    """Pallas forward of VectorizedLinear: out[e] = x[e] @ weight[e] + bias[e]."""
    E, B, In = x.shape
    E_w, In_w, Out = weight.shape
    assert (E, In) == (E_w, In_w), (x.shape, weight.shape)
    assert bias.shape == (E, 1, Out), bias.shape
    out_dtype = jnp.result_type(x.dtype, weight.dtype)

    if lane_target is None:
        lane_target = _mxu_lane_target()
    G = int(min(E, max(1, lane_target // max(In, Out))))

    # TODO(synk): for very large B with In/Out >= 128 the op becomes
    # compute-bound and block-diag packing wastes G x MXU FLOPs; the crossover
    # differs per generation (197/918/996 TF/s), so the dispatch could also
    # consider B.
    if G >= 2:
        compute = jnp.result_type(x.dtype, weight.dtype)
        return _forward_grouped(x.astype(compute), weight.astype(compute), bias,
                                G, out_dtype)

    # Wide layers: weight-DMA bound, so feed bf16 operands to the MXU
    # (f32 accumulation kept).  In a real model keep the params in bf16 to
    # avoid the extra cast round-trip.
    # TODO(synk): int8 (v5e/v6e) / fp8 (v7x) weight quantization for a further
    # 2x cut in HBM bytes on this path.
    if wide_path_bf16:
        x_c = x.astype(jnp.bfloat16)
        w_c = weight.astype(jnp.bfloat16)
    else:
        x_c, w_c = x, weight
    return _forward_tiled(x_c, w_c, bias, out_dtype)


# -------------------------- parameter initialization ------------------------ #
def init_vectorized_linear(key, in_features, out_features, ensemble_size):
    """Matches torch VectorizedLinear.reset_parameters (weight stored (in, out),
    so torch's fan_in convention picks dim 1 = out_features)."""
    kw, kb = jax.random.split(key)
    fan = out_features
    a = math.sqrt(5)
    gain = math.sqrt(2.0 / (1.0 + a * a))
    w_bound = gain * math.sqrt(3.0 / fan)
    w = jax.random.uniform(kw, (ensemble_size, in_features, out_features),
                           jnp.float32, -w_bound, w_bound)
    b_bound = 1.0 / math.sqrt(fan) if fan > 0 else 0.0
    b = jax.random.uniform(kb, (ensemble_size, 1, out_features),
                           jnp.float32, -b_bound, b_bound)
    return w, b


# ----------------------------------- main ------------------------------------ #
if __name__ == "__main__":
    key = jax.random.PRNGKey(0)
    k1, k2, k3, k4, k5, k6 = jax.random.split(key, 6)
    fwd = jax.jit(vectorized_linear_forward)

    # 1) SAC ensemble-critic shapes -> grouped block-diagonal path (one grid step).
    E, B, In, Out = 4, 8, 32, 32
    w, b = init_vectorized_linear(k1, In, Out, E)
    x = jax.random.normal(k2, (E, B, In), jnp.float32)
    out = jax.block_until_ready(fwd(x, w, b))
    ref = jnp.einsum("ebi,eio->ebo", x, w, precision="highest") + b
    assert out.shape == (E, B, Out)
    assert jnp.allclose(out, ref, atol=1e-3, rtol=1e-3), float(jnp.max(jnp.abs(out - ref)))

    # 2) Odd ensemble size + ragged batch -> exercises group/batch padding + slicing.
    E2, B2 = 7, 5
    w2, b2 = init_vectorized_linear(k3, In, Out, E2)
    x2 = jax.random.normal(k4, (E2, B2, In), jnp.float32)
    o2 = jax.block_until_ready(fwd(x2, w2, b2))
    ref2 = jnp.einsum("ebi,eio->ebo", x2, w2, precision="highest") + b2
    assert o2.shape == (E2, B2, Out)
    assert jnp.allclose(o2, ref2, atol=1e-3, rtol=1e-3), float(jnp.max(jnp.abs(o2 - ref2)))

    # 3) Wide layer -> K/N-tiled fallback path with bf16 operands (f32 accumulation).
    E3, B3, In3, Out3 = 3, 8, 512, 512
    w3, b3 = init_vectorized_linear(k5, In3, Out3, E3)
    x3 = jax.random.normal(k6, (E3, B3, In3), jnp.float32)
    o3 = jax.block_until_ready(fwd(x3, w3, b3))
    ref3 = jnp.einsum("ebi,eio->ebo",
                      x3.astype(jnp.bfloat16), w3.astype(jnp.bfloat16),
                      preferred_element_type=jnp.float32) + b3
    assert o3.shape == (E3, B3, Out3)
    assert jnp.allclose(o3, ref3, atol=2e-2, rtol=2e-2), float(jnp.max(jnp.abs(o3 - ref3)))

    print("KERNEL_OK")
</pallas_src>

<mosaic_0001>
module attributes {stable_mosaic.version = 11 : i64} {
  func.func @kernel(%arg0: i32, %arg1: memref<4x8x32xf32, #tpu.memory_space<vmem>>, %arg2: memref<4x32x32xf32, #tpu.memory_space<vmem>>, %arg3: memref<4x1x32xf32, #tpu.memory_space<vmem>>, %arg4: memref<4x8x32xf32, #tpu.memory_space<vmem>>, %arg5: memref<128x128xf32, #tpu.memory_space<vmem>>) attributes {dimension_semantics = [#tpu.dimension_semantics<parallel>], iteration_bounds = array<i64: 1>, scalar_prefetch = 0 : i64, scratch_operands = 1 : i64, tpu.core_type = #tpu.core_type<tc>, window_params = [{transform_indices = @transform_0, window_bounds = array<i64: 4, 8, 32>}, {transform_indices = @transform_1, window_bounds = array<i64: 4, 32, 32>}, {transform_indices = @transform_2, window_bounds = array<i64: 4, 1, 32>}, {transform_indices = @transform_3, window_bounds = array<i64: 4, 8, 32>}]} {
    %cst = arith.constant 0.000000e+00 : f32
    %0 = vector.broadcast %cst : f32 to vector<128x128xf32>
    %c0 = arith.constant 0 : index
    %c0_0 = arith.constant 0 : index
    %1 = vector.load %arg5[%c0, %c0_0] : memref<128x128xf32, #tpu.memory_space<vmem>>, vector<128x128xf32>
    tpu.vector_store %arg5[%c0, %c0_0], %0 {strides = array<i32>} : memref<128x128xf32, #tpu.memory_space<vmem>>, vector<128x128xf32>,
    %c0_1 = arith.constant 0 : index
    %c0_2 = arith.constant 0 : index
    %c0_3 = arith.constant 0 : index
    %2 = vector.load %arg2[%c0_1, %c0_2, %c0_3] : memref<4x32x32xf32, #tpu.memory_space<vmem>>, vector<1x32x32xf32>
    %3 = vector.shape_cast %2 : vector<1x32x32xf32> to vector<32x32xf32>
    %c0_4 = arith.constant 0 : index
    %c0_5 = arith.constant 0 : index
    %4 = vector.load %arg5[%c0_4, %c0_5] : memref<128x128xf32, #tpu.memory_space<vmem>>, vector<32x32xf32>
    tpu.vector_store %arg5[%c0_4, %c0_5], %3 {strides = array<i32>} : memref<128x128xf32, #tpu.memory_space<vmem>>, vector<32x32xf32>,
    %c1 = arith.constant 1 : index
    %c0_6 = arith.constant 0 : index
    %c0_7 = arith.constant 0 : index
    %5 = vector.load %arg2[%c1, %c0_6, %c0_7] : memref<4x32x32xf32, #tpu.memory_space<vmem>>, vector<1x32x32xf32>
    %6 = vector.shape_cast %5 : vector<1x32x32xf32> to vector<32x32xf32>
    %c32 = arith.constant 32 : index
    %c32_8 = arith.constant 32 : index
    %7 = vector.load %arg5[%c32, %c32_8] : memref<128x128xf32, #tpu.memory_space<vmem>>, vector<32x32xf32>
    tpu.vector_store %arg5[%c32, %c32_8], %6 {strides = array<i32>} : memref<128x128xf32, #tpu.memory_space<vmem>>, vector<32x32xf32>,
    %c2 = arith.constant 2 : index
    %c0_9 = arith.constant 0 : index
    %c0_10 = arith.constant 0 : index
    %8 = vector.load %arg2[%c2, %c0_9, %c0_10] : memref<4x32x32xf32, #tpu.memory_space<vmem>>, vector<1x32x32xf32>
    %9 = vector.shape_cast %8 : vector<1x32x32xf32> to vector<32x32xf32>
    %c64 = arith.constant 64 : index
    %c64_11 = arith.constant 64 : index
    %10 = vector.load %arg5[%c64, %c64_11] : memref<128x128xf32, #tpu.memory_space<vmem>>, vector<32x32xf32>
    tpu.vector_store %arg5[%c64, %c64_11], %9 {strides = array<i32>} : memref<128x128xf32, #tpu.memory_space<vmem>>, vector<32x32xf32>,
    %c3 = arith.constant 3 : index
    %c0_12 = arith.constant 0 : index
    %c0_13 = arith.constant 0 : index
    %11 = vector.load %arg2[%c3, %c0_12, %c0_13] : memref<4x32x32xf32, #tpu.memory_space<vmem>>, vector<1x32x32xf32>
    %12 = vector.shape_cast %11 : vector<1x32x32xf32> to vector<32x32xf32>
    %c96 = arith.constant 96 : index
    %c96_14 = arith.constant 96 : index
    %13 = vector.load %arg5[%c96, %c96_14] : memref<128x128xf32, #tpu.memory_space<vmem>>, vector<32x32xf32>
    tpu.vector_store %arg5[%c96, %c96_14], %12 {strides = array<i32>} : memref<128x128xf32, #tpu.memory_space<vmem>>, vector<32x32xf32>,
    %c0_15 = arith.constant 0 : index
    %c0_16 = arith.constant 0 : index
    %c0_17 = arith.constant 0 : index
    %14 = vector.load %arg1[%c0_15, %c0_16, %c0_17] : memref<4x8x32xf32, #tpu.memory_space<vmem>>, vector<1x8x32xf32>
    %15 = vector.shape_cast %14 : vector<1x8x32xf32> to vector<8x32xf32>
    %c1_18 = arith.constant 1 : index
    %c0_19 = arith.constant 0 : index
    %c0_20 = arith.constant 0 : index
    %16 = vector.load %arg1[%c1_18, %c0_19, %c0_20] : memref<4x8x32xf32, #tpu.memory_space<vmem>>, vector<1x8x32xf32>
    %17 = vector.shape_cast %16 : vector<1x8x32xf32> to vector<8x32xf32>
    %c2_21 = arith.constant 2 : index
    %c0_22 = arith.constant 0 : index
    %c0_23 = arith.constant 0 : index
    %18 = vector.load %arg1[%c2_21, %c0_22, %c0_23] : memref<4x8x32xf32, #tpu.memory_space<vmem>>, vector<1x8x32xf32>
    %19 = vector.shape_cast %18 : vector<1x8x32xf32> to vector<8x32xf32>
    %c3_24 = arith.constant 3 : index
    %c0_25 = arith.constant 0 : index
    %c0_26 = arith.constant 0 : index
    %20 = vector.load %arg1[%c3_24, %c0_25, %c0_26] : memref<4x8x32xf32, #tpu.memory_space<vmem>>, vector<1x8x32xf32>
    %21 = vector.shape_cast %20 : vector<1x8x32xf32> to vector<8x32xf32>
    %22 = tpu.concatenate %15, %17, %19, %21 in 1 : vector<8x32xf32>, vector<8x32xf32>, vector<8x32xf32>, vector<8x32xf32> -> vector<8x128xf32>
    %c0_27 = arith.constant 0 : index
    %c0_28 = arith.constant 0 : index
    %23 = vector.load %arg5[%c0_27, %c0_28] : memref<128x128xf32, #tpu.memory_space<vmem>>, vector<128x128xf32>
    %cst_29 = arith.constant dense<0.000000e+00> : vector<8x128xf32>
    %24 = tpu.matmul %22, %23, %cst_29 {dimension_numbers = #tpu.dot_dimension_numbers<[1], [0], [0], [1], [0, 0, 1, 1], [], []>} : vector<8x128xf32>, vector<128x128xf32>, vector<8x128xf32> -> vector<8x128xf32>
    %25 = vector.extract_strided_slice %24 {offsets = [0, 0], sizes = [8, 32], strides = [1, 1]} : vector<8x128xf32> to vector<8x32xf32>
    %c0_30 = arith.constant 0 : index
    %c0_31 = arith.constant 0 : index
    %c0_32 = arith.constant 0 : index
    %26 = vector.load %arg3[%c0_30, %c0_31, %c0_32] : memref<4x1x32xf32, #tpu.memory_space<vmem>>, vector<1x1x32xf32>
    %27 = vector.shape_cast %26 : vector<1x1x32xf32> to vector<1x32xf32>
    %28 = vector.broadcast %27 : vector<1x32xf32> to vector<8x32xf32>
    %29 = arith.addf %25, %28 : vector<8x32xf32>
    %c0_33 = arith.constant 0 : index
    %c0_34 = arith.constant 0 : index
    %c0_35 = arith.constant 0 : index
    %30 = vector.load %arg4[%c0_33, %c0_34, %c0_35] : memref<4x8x32xf32, #tpu.memory_space<vmem>>, vector<1x8x32xf32>
    %31 = vector.shape_cast %30 : vector<1x8x32xf32> to vector<8x32xf32>
    %32 = vector.shape_cast %29 : vector<8x32xf32> to vector<1x8x32xf32>
    tpu.vector_store %arg4[%c0_33, %c0_34, %c0_35], %32 {strides = array<i32>} : memref<4x8x32xf32, #tpu.memory_space<vmem>>, vector<1x8x32xf32>,
    %33 = vector.extract_strided_slice %24 {offsets = [0, 32], sizes = [8, 32], strides = [1, 1]} : vector<8x128xf32> to vector<8x32xf32>
    %c1_36 = arith.constant 1 : index
    %c0_37 = arith.constant 0 : index
    %c0_38 = arith.constant 0 : index
    %34 = vector.load %arg3[%c1_36, %c0_37, %c0_38] : memref<4x1x32xf32, #tpu.memory_space<vmem>>, vector<1x1x32xf32>
    %35 = vector.shape_cast %34 : vector<1x1x32xf32> to vector<1x32xf32>
    %36 = vector.broadcast %35 : vector<1x32xf32> to vector<8x32xf32>
    %37 = arith.addf %33, %36 : vector<8x32xf32>
    %c1_39 = arith.constant 1 : index
    %c0_40 = arith.constant 0 : index
    %c0_41 = arith.constant 0 : index
    %38 = vector.load %arg4[%c1_39, %c0_40, %c0_41] : memref<4x8x32xf32, #tpu.memory_space<vmem>>, vector<1x8x32xf32>
    %39 = vector.shape_cast %38 : vector<1x8x32xf32> to vector<8x32xf32>
    %40 = vector.shape_cast %37 : vector<8x32xf32> to vector<1x8x32xf32>
    tpu.vector_store %arg4[%c1_39, %c0_40, %c0_41], %40 {strides = array<i32>} : memref<4x8x32xf32, #tpu.memory_space<vmem>>, vector<1x8x32xf32>,
    %41 = vector.extract_strided_slice %24 {offsets = [0, 64], sizes = [8, 32], strides = [1, 1]} : vector<8x128xf32> to vector<8x32xf32>
    %c2_42 = arith.constant 2 : index
    %c0_43 = arith.constant 0 : index
    %c0_44 = arith.constant 0 : index
    %42 = vector.load %arg3[%c2_42, %c0_43, %c0_44] : memref<4x1x32xf32, #tpu.memory_space<vmem>>, vector<1x1x32xf32>
    %43 = vector.shape_cast %42 : vector<1x1x32xf32> to vector<1x32xf32>
    %44 = vector.broadcast %43 : vector<1x32xf32> to vector<8x32xf32>
    %45 = arith.addf %41, %44 : vector<8x32xf32>
    %c2_45 = arith.constant 2 : index
    %c0_46 = arith.constant 0 : index
    %c0_47 = arith.constant 0 : index
    %46 = vector.load %arg4[%c2_45, %c0_46, %c0_47] : memref<4x8x32xf32, #tpu.memory_space<vmem>>, vector<1x8x32xf32>
    %47 = vector.shape_cast %46 : vector<1x8x32xf32> to vector<8x32xf32>
    %48 = vector.shape_cast %45 : vector<8x32xf32> to vector<1x8x32xf32>
    tpu.vector_store %arg4[%c2_45, %c0_46, %c0_47], %48 {strides = array<i32>} : memref<4x8x32xf32, #tpu.memory_space<vmem>>, vector<1x8x32xf32>,
    %49 = vector.extract_strided_slice %24 {offsets = [0, 96], sizes = [8, 32], strides = [1, 1]} : vector<8x128xf32> to vector<8x32xf32>
    %c3_48 = arith.constant 3 : index
    %c0_49 = arith.constant 0 : index
    %c0_50 = arith.constant 0 : index
    %50 = vector.load %arg3[%c3_48, %c0_49, %c0_50] : memref<4x1x32xf32, #tpu.memory_space<vmem>>, vector<1x1x32xf32>
    %51 = vector.shape_cast %50 : vector<1x1x32xf32> to vector<1x32xf32>
    %52 = vector.broadcast %51 : vector<1x32xf32> to vector<8x32xf32>
    %53 = arith.addf %49, %52 : vector<8x32xf32>
    %c3_51 = arith.constant 3 : index
    %c0_52 = arith.constant 0 : index
    %c0_53 = arith.constant 0 : index
    %54 = vector.load %arg4[%c3_51, %c0_52, %c0_53] : memref<4x8x32xf32, #tpu.memory_space<vmem>>, vector<1x8x32xf32>
    %55 = vector.shape_cast %54 : vector<1x8x32xf32> to vector<8x32xf32>
    %56 = vector.shape_cast %53 : vector<8x32xf32> to vector<1x8x32xf32>
    tpu.vector_store %arg4[%c3_51, %c0_52, %c0_53], %56 {strides = array<i32>} : memref<4x8x32xf32, #tpu.memory_space<vmem>>, vector<1x8x32xf32>,
    return
  }
  func.func @transform_0(%arg0: i32) -> (i32, i32, i32) {
    %c0_i32 = arith.constant 0 : i32
    %c0_i32_0 = arith.constant 0 : i32
    %c0_i32_1 = arith.constant 0 : i32
    return %arg0, %c0_i32, %c0_i32_0 : i32, i32, i32
  }
  func.func @transform_1(%arg0: i32) -> (i32, i32, i32) {
    %c0_i32 = arith.constant 0 : i32
    %c0_i32_0 = arith.constant 0 : i32
    %c0_i32_1 = arith.constant 0 : i32
    return %arg0, %c0_i32, %c0_i32_0 : i32, i32, i32
  }
  func.func @transform_2(%arg0: i32) -> (i32, i32, i32) {
    %c0_i32 = arith.constant 0 : i32
    %c0_i32_0 = arith.constant 0 : i32
    %c0_i32_1 = arith.constant 0 : i32
    return %arg0, %c0_i32, %c0_i32_0 : i32, i32, i32
  }
  func.func @transform_3(%arg0: i32) -> (i32, i32, i32) {
    %c0_i32 = arith.constant 0 : i32
    %c0_i32_0 = arith.constant 0 : i32
    %c0_i32_1 = arith.constant 0 : i32
    return %arg0, %c0_i32, %c0_i32_0 : i32, i32, i32
  }
}

</mosaic_0001>

<bundles_post_ra>
// kernel: vectorized_linear_forward.1
= control target key start
LH: loop header
LB: loop body
LE: loop exit
PB: predicated region body
PF: predicated region fallthrough
CT: control target
= control target key end

     0   :  { %8 = vsyncpa [#allocation4], 0  ;;  %s647_s0 = inlined_call_operand.hbm [shape: f32[4,8,32], index: 0, kind: input, shape index: {}]   ;;  %s648_s1 = inlined_call_operand.hbm [shape: f32[4,32,32], index: 1, kind: input, shape index: {}]   ;;  %s649_s2 = inlined_call_operand.vmem [shape: f32[4,1,32], index: 2, kind: input, shape index: {}]   ;;  %s650_s3 = inlined_call_operand.hbm [shape: f32[4,8,32], index: 3, kind: output, shape index: {}]  }
   0x1   :  { %9 = vsyncpa [#allocation7], 0 }
   0x2   :  { %10 = vsyncpa [#allocation5], 0  ;;  %s500_s12 = smov [#allocation3]   ;;  %s428_s16 = scalar_lea.hbm %s647_s0, 512 }
   0x3   :  { %s16_s13 = sshll.u32 %s500_s12, 4  ;;  %p429_p0 = scmp.ne.s32.totalorder %s647_s0, %s428_s16  ;;  %s17_s13 = int_to_ptr.vmem [resolvable:$true] %s16_s13 }
   0x4   :  { %p432_p1 = scmp.lt.u32.totalorder %s428_s16, %s647_s0 }
   0x6   :  { %p434_p2 = pnand %p432_p1, %p429_p0 }
   0x8   :  { %437 = shalt.err (!%p434_p2)
}
   0x9   :  { %s438_s21 = scalar_lea.vmem %s17_s13, 512  ;;  %p443_p4 = scmp.lt.s32.totalorder %s17_s13, %s17_s13 }
   0xa   :  { %p439_p3 = scmp.ne.s32.totalorder %s17_s13, %s438_s21  ;;  %p444_p5 = scmp.lt.s32.totalorder %s438_s21, %s438_s21 }
   0xc   :  { %p445_p6 = por %p444_p5, %p443_p4 }
   0xe   :  { %p446_p7 = pnand %p445_p6, %p439_p3 }
  0x10   :  { %449 = shalt.err (!%p446_p7)
}
  0x11   :  { %s501_s22 = smov 128   ;;  %s502_s23 = smov 8  }
  0x12   :  { %22 = dma.hbm_to_vmem [thread:$0]  %s647_s0, 512, %s17_s13, [#allocation4], %s501_s22, %s501_s22, %s502_s23  }
  0x13   :  { %s503_s26 = smov [#allocation6]   ;;  %s450_s30 = scalar_lea.hbm %s648_s1, 2048 }
  0x14   :  { %s28_s27 = sshll.u32 %s503_s26, 4  ;;  %p451_p8 = scmp.ne.s32.totalorder %s648_s1, %s450_s30  ;;  %s29_s27 = int_to_ptr.vmem [resolvable:$true] %s28_s27 }
  0x15   :  { %p454_p9 = scmp.lt.u32.totalorder %s450_s30, %s648_s1 }
  0x17   :  { %p456_p10 = pnand %p454_p9, %p451_p8 }
  0x19   :  { %459 = shalt.err (!%p456_p10)
}
  0x1a   :  { %s460_s8 = scalar_lea.vmem %s29_s27, 2048  ;;  %p465_p12 = scmp.lt.s32.totalorder %s29_s27, %s29_s27 }
  0x1b   :  { %p461_p11 = scmp.ne.s32.totalorder %s29_s27, %s460_s8  ;;  %p466_p13 = scmp.lt.s32.totalorder %s460_s8, %s460_s8 }
  0x1d   :  { %p467_p0 = por %p466_p13, %p465_p12 }
  0x1f   :  { %p468_p1 = pnand %p467_p0, %p461_p11 }
  0x21   :  { %471 = shalt.err (!%p468_p1)
}
  0x22   :  { %34 = dma.hbm_to_vmem [thread:$0]  %s648_s1, 2048, %s29_s27, [#allocation7], %s501_s22, %s501_s22, %s502_s23  }
  0x23   :  { %494 = dma.done.wait [#allocation4], 512  }
  0x24   :  { %495 = vsyncadd [#allocation4], 4294966784 }
  0x25   :  { %496 = dma.done.wait [#allocation7], 2048  }
  0x26   :  { %497 = vsyncadd [#allocation7], 4294965248  ;;  %v504_v0 = vmov 0.0   ;;  %v505_v1 = vmov 0.0|0.0   ;;  %v71_v2 = vld [vmem:[#allocation6 + $0x30] sm:$0xff]  ;;  %v69_v3 = vld [vmem:[#allocation6 + $0x20] sm:$0xff] }
  0x27   :  { %49 = vst [vmem:[#allocation2 + $0x30] sm:$0xff] %v504_v0  ;;  %43 = vst [vmem:[#allocation2] sm:$0xff] %v504_v0  ;;  %393 = vmatprep.subr.bf16.mxu0 %v505_v1  ;;  %s506_s1 = smov 32   ;;  %v72_v4 = vld [vmem:[#allocation6 + $0x38] sm:$0xff]  ;;  %v70_v5 = vld [vmem:[#allocation6 + $0x28] sm:$0xff]  ;;  %vm63_vm0 = vcmask 261120  }
  0x28   :  { %44 = vst [vmem:[#allocation2 + $0x8] sm:$0xff] %v504_v0  ;;  %45 = vst [vmem:[#allocation2 + $0x10] sm:$0xff] %v504_v0  ;;  %81 = vrot.lane.b32.xlu1 %v71_v2, %s506_s1  ;;  %77 = vrot.lane.b32.xlu0 %v69_v3, %s506_s1  ;;  %v59_v6 = vld [vmem:[#allocation6] sm:$0xff]  ;;  %v60_v7 = vld [vmem:[#allocation6 + $0x8] sm:$0xff]  ;;  %s507_s10 = smov 64   ;;  %s508_s11 = smov 96  }
  0x29   :  { %46 = vst [vmem:[#allocation2 + $0x18] sm:$0xff] %v504_v0  ;;  %47 = vst [vmem:[#allocation2 + $0x20] sm:$0xff] %v504_v0  ;;  %v61_v8 = vld [vmem:[#allocation6 + $0x10] sm:$0xff]  ;;  %v96_v9 = vld [vmem:[#allocation6 + $0x48] sm:$0xff]  ;;  %vm509_vm1 = vmmov 0   ;;  %vm89_vm2 = vcmask 523520  }
  0x2a   :  { %48 = vst [vmem:[#allocation2 + $0x28] sm:$0xff] %v504_v0  ;;  %50 = vst [vmem:[#allocation2 + $0x38] sm:$0xff] %v504_v0  ;;  %v95_v10 = vld [vmem:[#allocation6 + $0x40] sm:$0xff]  ;;  %v62_v11 = vld [vmem:[#allocation6 + $0x18] sm:$0xff]  ;;  %390 = vmatprep.mubr.msk.f32.mxu0 %vm509_vm1, %v504_v0  ;;  %vm115_vm3 = vcmask 785920   ;;  %vm141_vm4 = vcmask 1048320  }
  0x2b   :  { %51 = vst [vmem:[#allocation2 + $0x40] sm:$0xff] %v504_v0  ;;  %52 = vst [vmem:[#allocation2 + $0x48] sm:$0xff] %v504_v0  ;;  %v98_v12 = vld [vmem:[#allocation6 + $0x58] sm:$0xff]  ;;  %v97_v13 = vld [vmem:[#allocation6 + $0x50] sm:$0xff]  ;;  %vm166_vm5 = vcmask 523264   ;;  %vm168_vm6 = vcmask 785408  }
  0x2c   :  { %53 = vst [vmem:[#allocation2 + $0x50] sm:$0xff] %v504_v0  ;;  %54 = vst [vmem:[#allocation2 + $0x58] sm:$0xff] %v504_v0  ;;  %83 = vrot.lane.b32.xlu1 %v72_v4, %s506_s1  ;;  %79 = vrot.lane.b32.xlu0 %v70_v5, %s506_s1  ;;  %v122_v17 = vld [vmem:[#allocation6 + $0x68] sm:$0xff]  ;;  %v121_v18 = vld [vmem:[#allocation6 + $0x60] sm:$0xff]  ;;  %s510_s20 = smov [#allocation8]  }
  0x2d   :  { %55 = vst [vmem:[#allocation2 + $0x60] sm:$0xff] %v504_v0  ;;  %56 = vst [vmem:[#allocation2 + $0x68] sm:$0xff] %v504_v0  ;;  %v124_v22 = vld [vmem:[#allocation6 + $0x78] sm:$0xff]  ;;  %v123_v23 = vld [vmem:[#allocation6 + $0x70] sm:$0xff]  ;;  %s321_s21 = sshll.u32 %s510_s20, 4  ;;  %s322_s21 = int_to_ptr.vmem [resolvable:$true] %s321_s21 }
  0x2e   :  { %57 = vst [vmem:[#allocation2 + $0x70] sm:$0xff] %v504_v0  ;;  %58 = vst [vmem:[#allocation2 + $0x78] sm:$0xff] %v504_v0  ;;  %v148_v24 = vld [vmem:[#allocation3 + $0x8] sm:$0xff]  ;;  %v150_v25 = vld [vmem:[#allocation3 + $0x10] sm:$0xff]  ;;  %p477_p3 = scmp.lt.s32.totalorder %s322_s21, %s322_s21 }
  0x2f   :  { %64 = vst.msk [vmem:[#allocation2] sm:$0xff] %vm63_vm0, %v59_v6  ;;  %65 = vst.msk [vmem:[#allocation2 + $0x8] sm:$0xff] %vm63_vm0, %v60_v7  ;;  %v152_v26 = vld [vmem:[#allocation3 + $0x18] sm:$0xff]  ;;  %v336_v27 = vld [vmem:[%s649_s2 + $0x1] ss:$0 sm:$0xff] }
  0x30   :  { %66 = vst.msk [vmem:[#allocation2 + $0x10] sm:$0xff] %vm63_vm0, %v61_v8  ;;  %67 = vst.msk [vmem:[#allocation2 + $0x18] sm:$0xff] %vm63_vm0, %v62_v11  ;;  %105 = vrot.lane.b32.xlu1 %v96_v9, %s507_s10  ;;  %103 = vrot.lane.b32.xlu0 %v95_v10, %s507_s10  ;;  %v340_v28 = vld [vmem:[%s649_s2 + $0x3] ss:$0 sm:$0xff]  ;;  %v338_v29 = vld [vmem:[%s649_s2 + $0x2] ss:$0 sm:$0xff] }
  0x31   :  { %v146_v57 = vld [vmem:[#allocation3] sm:$0xff] }
  0x32   :  { %v334_v6 = vld [vmem:[%s649_s2] ss:$0 sm:$0xff]  ;;  %s472_s2 = scalar_lea.vmem %s322_s21, 512 }
  0x33   :  { %p473_p2 = scmp.ne.s32.totalorder %s322_s21, %s472_s2  ;;  %p478_p4 = scmp.lt.s32.totalorder %s472_s2, %s472_s2 }
  0x34   :  { %109 = vrot.lane.b32.xlu1 %v98_v12, %s507_s10  ;;  %107 = vrot.lane.b32.xlu0 %v97_v13, %s507_s10 }
  0x35   :  { %p479_p5 = por %p478_p4, %p477_p3 }
  0x36   :  { %v170_v14 = vld [vmem:[#allocation2] sm:$0xff]  ;;  %v171_v15 = vld [vmem:[#allocation2 + $0x8] sm:$0xff] }
  0x37   :  { %v172_v16 = vld [vmem:[#allocation2 + $0x10] sm:$0xff]  ;;  %v394_v19 = vpack.c.bf16 %v171_v15, %v170_v14  ;;  %v173_v20 = vld [vmem:[#allocation2 + $0x18] sm:$0xff]  ;;  %p480_p6 = pnand %p479_p5, %p473_p2 }
  0x38   :  { %v397_v21 = vpack.c.bf16 %v173_v20, %v172_v16  ;;  %131 = vrot.lane.b32.xlu1 %v122_v17, %s508_s11  ;;  %129 = vrot.lane.b32.xlu0 %v121_v18, %s508_s11 }
  0x39   :  { %395 = vmatpush3.bf16.msra.mxu0 %v394_v19 }
  0x3a   :  { %396 = vmatprep.subr.bf16.mxu0 %v505_v1 }
  0x3c   :  { %135 = vrot.lane.b32.xlu1 %v124_v22, %s508_s11  ;;  %133 = vrot.lane.b32.xlu0 %v123_v23, %s508_s11 }
  0x3d   :  { %398 = vmatpush3.bf16.msra.mxu0 %v397_v21 }
  0x3e   :  { %399 = vmatprep.subr.bf16.mxu0 %v505_v1 }
  0x40   :  { %154 = vrot.lane.b32.xlu0 %v148_v24, %s506_s1  ;;  %158 = vrot.lane.b32.xlu1 %v150_v25, %s507_s10 }
  0x44   :  { %162 = vrot.lane.b32.xlu0 %v152_v26, %s508_s11  ;;  %272 = vrot.lane.b32.xlu1 %v336_v27, %s506_s1 }
  0x48   :  { %306 = vrot.lane.b32.xlu1 %v340_v28, %s508_s11  ;;  %289 = vrot.lane.b32.xlu0 %v338_v29, %s507_s10 }
  0x9a   :  { %v82_v30 = vpop.permute.xlu1 %81  ;;  %v78_v31 = vpop.permute.xlu0 %77 }
  0x9b   :  { %92 = vst.msk [vmem:[#allocation2 + $0x30] sm:$0xff] %vm89_vm2, %v82_v30  ;;  %90 = vst.msk [vmem:[#allocation2 + $0x20] sm:$0xff] %vm89_vm2, %v78_v31 }
  0x9e   :  { %v84_v32 = vpop.permute.xlu1 %83  ;;  %v80_v33 = vpop.permute.xlu0 %79 }
  0x9f   :  { %93 = vst.msk [vmem:[#allocation2 + $0x38] sm:$0xff] %vm89_vm2, %v84_v32  ;;  %91 = vst.msk [vmem:[#allocation2 + $0x28] sm:$0xff] %vm89_vm2, %v80_v33 }
  0xa2   :  { %v106_v34 = vpop.permute.xlu1 %105  ;;  %v104_v35 = vpop.permute.xlu0 %103  ;;  %v174_v36 = vld [vmem:[#allocation2 + $0x20] sm:$0xff]  ;;  %v176_v41 = vld [vmem:[#allocation2 + $0x30] sm:$0xff] }
  0xa3   :  { %117 = vst.msk [vmem:[#allocation2 + $0x48] sm:$0xff] %vm115_vm3, %v106_v34  ;;  %116 = vst.msk [vmem:[#allocation2 + $0x40] sm:$0xff] %vm115_vm3, %v104_v35 }
  0xa6   :  { %v175_v37 = vld [vmem:[#allocation2 + $0x28] sm:$0xff]  ;;  %v110_v38 = vpop.permute.xlu1 %109  ;;  %v108_v39 = vpop.permute.xlu0 %107  ;;  %v177_v42 = vld [vmem:[#allocation2 + $0x38] sm:$0xff] }
  0xa7   :  { %v400_v40 = vpack.c.bf16 %v175_v37, %v174_v36  ;;  %119 = vst.msk [vmem:[#allocation2 + $0x58] sm:$0xff] %vm115_vm3, %v110_v38  ;;  %118 = vst.msk [vmem:[#allocation2 + $0x50] sm:$0xff] %vm115_vm3, %v108_v39  ;;  %v403_v47 = vpack.c.bf16 %v177_v42, %v176_v41 }
  0xa9   :  { %401 = vmatpush3.bf16.msra.mxu0 %v400_v40 }
  0xaa   :  { %402 = vmatprep.subr.bf16.mxu0 %v505_v1  ;;  %v132_v43 = vpop.permute.xlu1 %131  ;;  %v130_v44 = vpop.permute.xlu0 %129  ;;  %v178_v45 = vld [vmem:[#allocation2 + $0x40] sm:$0xff]  ;;  %v179_v46 = vld [vmem:[#allocation2 + $0x48] sm:$0xff] }
  0xab   :  { %143 = vst.msk [vmem:[#allocation2 + $0x68] sm:$0xff] %vm141_vm4, %v132_v43  ;;  %142 = vst.msk [vmem:[#allocation2 + $0x60] sm:$0xff] %vm141_vm4, %v130_v44  ;;  %v406_v48 = vpack.c.bf16 %v179_v46, %v178_v45 }
  0xad   :  { %404 = vmatpush3.bf16.msra.mxu0 %v403_v47 }
  0xae   :  { %405 = vmatprep.subr.bf16.mxu0 %v505_v1  ;;  %v136_v49 = vpop.permute.xlu1 %135  ;;  %v134_v50 = vpop.permute.xlu0 %133  ;;  %v180_v51 = vld [vmem:[#allocation2 + $0x50] sm:$0xff]  ;;  %v181_v52 = vld [vmem:[#allocation2 + $0x58] sm:$0xff] }
  0xaf   :  { %145 = vst.msk [vmem:[#allocation2 + $0x78] sm:$0xff] %vm141_vm4, %v136_v49  ;;  %144 = vst.msk [vmem:[#allocation2 + $0x70] sm:$0xff] %vm141_vm4, %v134_v50  ;;  %v409_v53 = vpack.c.bf16 %v181_v52, %v180_v51 }
  0xb1   :  { %407 = vmatpush3.bf16.msra.mxu0 %v406_v48 }
  0xb2   :  { %408 = vmatprep.subr.bf16.mxu0 %v505_v1  ;;  %v182_v54 = vld [vmem:[#allocation2 + $0x60] sm:$0xff]  ;;  %v183_v55 = vld [vmem:[#allocation2 + $0x68] sm:$0xff]  ;;  %v155_v58 = vpop.permute.xlu0 %154  ;;  %v159_v62 = vpop.permute.xlu1 %158 }
  0xb3   :  { %v412_v56 = vpack.c.bf16 %v183_v55, %v182_v54  ;;  %v165_v61 = vsel %vm63_vm0, %v146_v57, %v155_v58 }
  0xb4   :  { %v167_v0 = vsel %vm166_vm5, %v165_v61, %v159_v62 }
  0xb5   :  { %410 = vmatpush3.bf16.msra.mxu0 %v409_v53 }
  0xb6   :  { %411 = vmatprep.subr.bf16.mxu0 %v505_v1  ;;  %v184_v59 = vld [vmem:[#allocation2 + $0x70] sm:$0xff]  ;;  %v185_v60 = vld [vmem:[#allocation2 + $0x78] sm:$0xff]  ;;  %v163_v2 = vpop.permute.xlu0 %162  ;;  %v273_v4 = vpop.permute.xlu1 %272 }
  0xb7   :  { %v415_v63 = vpack.c.bf16 %v185_v60, %v184_v59  ;;  %v169_v3 = vsel %vm168_vm6, %v167_v0, %v163_v2 }
  0xb9   :  { %413 = vmatpush3.bf16.msra.mxu0 %v412_v56 }
  0xba   :  { %414 = vmatprep.subr.bf16.mxu0 %v505_v1  ;;  %v290_v5 = vpop.permute.xlu0 %289  ;;  %v307_v12 = vpop.permute.xlu1 %306 }
  0xbd   :  { %416 = vmatpush3.bf16.msra.mxu0 %v415_v63 }
  0xc0   :  { %391 = vmatmul.mubr.f32.vlgmr.msra.gmra.mrb[0].mxu0 %v169_v3 }
 0x193   :  { %v252_v7 = vpop.f32.mrb[0].mxu0 }
 0x194   :  { %v263_v8 = vadd.f32 %v334_v6, %v252_v7  ;;  %v392_v9 = vpop.f32.mrb[1].mxu0  ;;  %v292_v10 = vadd.f32 %v290_v5, %v252_v7  ;;  %v275_v11 = vadd.f32 %v273_v4, %v252_v7  ;;  %v309_v1 = vadd.f32 %v307_v12, %v252_v7 }
 0x196   :  { %264 = vst.msk [vmem:[#allocation8] sm:$0xff] %vm63_vm0, %v263_v8  ;;  %294 = vrot.lane.b32.xlu1 %v292_v10, %s507_s10  ;;  %277 = vrot.lane.b32.xlu0 %v275_v11, %s508_s11 }
 0x19a   :  { %311 = vrot.lane.b32.xlu0 %v309_v1, %s506_s1 }
 0x208   :  { %v295_v13 = vpop.permute.xlu1 %294  ;;  %v278_v14 = vpop.permute.xlu0 %277 }
 0x209   :  { %298 = vst.msk [vmem:[#allocation8 + $0x10] sm:$0xff] %vm63_vm0, %v295_v13  ;;  %281 = vst.msk [vmem:[#allocation8 + $0x8] sm:$0xff] %vm63_vm0, %v278_v14 }
 0x20c   :  { %v312_v15 = vpop.permute.xlu0 %311 }
 0x20d   :  { %315 = vst.msk [vmem:[#allocation8 + $0x18] sm:$0xff] %vm63_vm0, %v312_v15 }
 0x20e   :  { %483 = shalt.err (!%p480_p6)
}
 0x20f   :  { %s484_s26 = scalar_lea.hbm %s650_s3, 512 }
 0x210   :  { %p485_p7 = scmp.ne.s32.totalorder %s650_s3, %s484_s26  ;;  %p488_p8 = scmp.lt.u32.totalorder %s484_s26, %s650_s3 }
 0x212   :  { %p490_p9 = pnand %p488_p8, %p485_p7 }
 0x214   :  { %493 = shalt.err (!%p490_p9)
}
 0x215   :  { %327 = dma.vmem_to_hbm [thread:$0]  %s322_s21, 512, %s650_s3, [#allocation5], %s501_s22, %s501_s22, %s502_s23  }
 0x216   :  { %498 = dma.done.wait [#allocation5], 512  }
 0x217   :  { %499 = vsyncadd [#allocation5], 4294966784 }
 0x218   :  { %331 = vsyncpa [#allocation4], 1 }
 0x219   :  { %332 = vsyncpa [#allocation7], 1 }
 0x21a   :  { %333 = vsyncpa [#allocation5], 1 }

</bundles_post_ra>
